<compile_context>
chip_gen: v7x
topology: tpu7x:2x2x1
jax: 0.10.0
libtpu: 0.0.40
codegen_flags: <defaults>
</compile_context>

<pallas_src>
import numpy as np
import jax
import jax.numpy as jnp
from jax.experimental import pallas as pl
from jax.experimental.pallas import tpu as pltpu


def _round_up(x, m):
    return ((x + m - 1) // m) * m


def _critic_kernel(s_ref, a_ref, w1_ref, b1_ref, w2s_ref, w2a_ref, b2_ref,
                   w3_ref, b3_ref, o_ref):
    # s_ref: [tb, S] f32, a_ref: [tb, A_pad] f32 (action cols 0:A, rest 0).
    s = s_ref[...].astype(jnp.bfloat16)
    a = a_ref[...].astype(jnp.bfloat16)

    # fc1 + relu  (bf16 MXU operands, f32 accumulate, f32 elementwise)
    xs = jnp.dot(s, w1_ref[...], preferred_element_type=jnp.float32) + b1_ref[...]
    xs = jnp.maximum(xs, 0.0)

    # fc2(cat(xs, action)) == xs @ W2s + action @ W2a + b2
    h = (jnp.dot(xs.astype(jnp.bfloat16), w2s_ref[...],
                 preferred_element_type=jnp.float32)
         + jnp.dot(a, w2a_ref[...], preferred_element_type=jnp.float32)
         + b2_ref[...])
    h = jnp.maximum(h, 0.0)

    # fc3 — logits over atoms, columns lane-padded to 128 (extras are zero).
    out = (jnp.dot(h.astype(jnp.bfloat16), w3_ref[...],
                   preferred_element_type=jnp.float32) + b3_ref[...])
    o_ref[...] = out.astype(o_ref.dtype)   # bf16 store -> half the writeback
    # TODO(synk): distr_to_q (softmax over atoms * supports) could be fused
    # here to emit [tb, 1]; kept out to preserve forward() semantics (logits).


def init_params(key, state_size, action_size, fc1_units=128, fc2_units=128,
                fc3_units=128, n_atoms=51):
    """Logical (unpadded, f32) params mirroring CriticD4PG.__init__/reset_parameters.

    PyTorch Linear weight is [out, in]; hidden_init uses fan = weight.size(0)
    = out_features, lim = 1/sqrt(out).  Weights stored transposed as [in, out].
    Biases keep PyTorch's default Linear bias init range 1/sqrt(in_features).
    """
    assert fc1_units == fc2_units, \
        "CriticD4PG.forward requires fc1_units == fc2_units (cat(xs, action) feeds fc2)"
    ks = jax.random.split(key, 6)

    def u(k, shape, lim):
        return jax.random.uniform(k, shape, jnp.float32, -lim, lim)

    w1 = u(ks[0], (state_size, fc1_units), 1.0 / np.sqrt(fc1_units))
    b1 = u(ks[1], (fc1_units,), 1.0 / np.sqrt(state_size))

    in2 = fc2_units + action_size
    w2 = u(ks[2], (in2, fc3_units), 1.0 / np.sqrt(fc3_units))
    b2 = u(ks[3], (fc3_units,), 1.0 / np.sqrt(in2))

    w3 = u(ks[4], (fc3_units, n_atoms), 1.0 / np.sqrt(n_atoms))
    b3 = u(ks[5], (n_atoms,), 1.0 / np.sqrt(fc3_units))
    return (w1, b1, w2, b2, w3, b3)


def pack_params(params, state_size, action_size):
    """Convert logical f32 params to kernel-ready padded bf16/f32 params."""
    w1, b1, w2, b2, w3, b3 = params
    fc1 = w1.shape[1]
    fc3 = w2.shape[1]
    n_atoms = w3.shape[1]
    hidden_in = w2.shape[0] - action_size          # == fc2_units
    assert hidden_in == fc1, \
        "CriticD4PG.forward requires fc1_units == fc2_units (cat(xs, action) feeds fc2)"

    a_pad = _round_up(max(action_size, 8), 8)      # tiny sublane-friendly K
    out_pad = _round_up(n_atoms, 128)              # lane-dense output stores

    # fc2 split: hidden block (xs rows) and action block (only A real rows).
    w2s = w2[:hidden_in]
    w2a = jnp.zeros((a_pad, fc3), jnp.float32).at[:action_size].set(w2[hidden_in:])
    # fc3 lane-padded output columns.
    w3p = jnp.zeros((fc3, out_pad), jnp.float32).at[:, :n_atoms].set(w3)
    b3p = jnp.zeros((1, out_pad), jnp.float32).at[:, :n_atoms].set(b3[None, :])

    return dict(
        w1=w1.astype(jnp.bfloat16),
        b1=b1.reshape(1, -1).astype(jnp.float32),
        w2s=w2s.astype(jnp.bfloat16),
        w2a=w2a.astype(jnp.bfloat16),
        b2=b2.reshape(1, -1).astype(jnp.float32),
        w3=w3p.astype(jnp.bfloat16),
        b3=b3p,
        n_atoms=int(n_atoms),
        state_size=int(state_size),
        action_size=int(action_size),
        a_pad=int(a_pad),
        out_pad=int(out_pad),
    )


def critic_d4pg_forward(state, action, kparams, *, batch_tile=1024):
    """CriticD4PG.forward inside one Pallas kernel.

    state:  [B, state_size]  f32
    action: [B, action_size] f32
    returns [B, n_atoms]     f32 (unnormalized distribution logits)
    """
    B, S = state.shape
    A = action.shape[1]
    a_pad = kparams["a_pad"]
    out_pad = kparams["out_pad"]
    n_atoms = kparams["n_atoms"]

    # Grid steps: big tiles amortize the ~0.35us/step overhead; keep >= 2
    # steps for larger batches so the "parallel" axis splits across v7x's two
    # TensorCores (no-op on single-TC v5e/v6e).
    num_steps = max(1, -(-B // batch_tile))
    if B > 256:
        num_steps = max(num_steps, 2)
    # Balanced tile (multiple of 8) minimizes batch padding for ragged B.
    tb = _round_up(-(-B // num_steps), 8)
    Bp = tb * num_steps

    state_f = state.astype(jnp.float32)
    action_f = action.astype(jnp.float32)
    pad_rows = Bp - B
    if pad_rows:
        state_f = jnp.pad(state_f, ((0, pad_rows), (0, 0)))
    if pad_rows or a_pad != A:
        action_f = jnp.pad(action_f, ((0, pad_rows), (0, a_pad - A)))

    weights = (kparams["w1"], kparams["b1"], kparams["w2s"], kparams["w2a"],
               kparams["b2"], kparams["w3"], kparams["b3"])
    # Weights stay resident in VMEM across all batch tiles (constant index_map
    # -> no per-step re-DMA).
    resident = lambda a: pl.BlockSpec(a.shape, lambda i: (0, 0))

    out = pl.pallas_call(
        _critic_kernel,
        out_shape=jax.ShapeDtypeStruct((Bp, out_pad), jnp.bfloat16),
        grid=(num_steps,),
        in_specs=[pl.BlockSpec((tb, S), lambda i: (i, 0)),
                  pl.BlockSpec((tb, a_pad), lambda i: (i, 0))]
                 + [resident(w) for w in weights],
        out_specs=pl.BlockSpec((tb, out_pad), lambda i: (i, 0)),
        compiler_params=pltpu.CompilerParams(
            dimension_semantics=("parallel",)),   # shards batch over v7x's 2 TCs
    )(state_f, action_f, *weights)

    return out[:B, :n_atoms].astype(jnp.float32)


def reference_forward(state, action, params):
    """Plain-JAX f32 reference (mirrors the PyTorch forward)."""
    w1, b1, w2, b2, w3, b3 = params
    xs = jax.nn.relu(state @ w1 + b1)
    x = jnp.concatenate([xs, action], axis=1)
    x = jax.nn.relu(x @ w2 + b2)
    return x @ w3 + b3


if __name__ == "__main__":
    key = jax.random.PRNGKey(0)
    k_state, k_action, k_params, k_state2, k_action2 = jax.random.split(key, 5)

    state_size = 16
    action_size = 4
    n_atoms = 51

    params = init_params(k_params, state_size, action_size, n_atoms=n_atoms)
    kparams = pack_params(params, state_size, action_size)

    # Small smoke test (single grid step).
    B = 8
    state = jax.random.normal(k_state, (B, state_size), jnp.float32)
    action = jax.random.normal(k_action, (B, action_size), jnp.float32)
    out = jax.block_until_ready(critic_d4pg_forward(state, action, kparams))
    ref = reference_forward(state, action, params)
    np.testing.assert_allclose(np.asarray(out), np.asarray(ref),
                               rtol=2e-2, atol=2e-2)

    # Larger, non-multiple batch: exercises a 2-step grid with balanced tiles
    # (2 x 152 rows, only 4 padding rows) + the lane-padded output slice.
    B2 = 300
    state2 = jax.random.normal(k_state2, (B2, state_size), jnp.float32)
    action2 = jax.random.normal(k_action2, (B2, action_size), jnp.float32)
    out2 = jax.block_until_ready(critic_d4pg_forward(state2, action2, kparams))
    ref2 = reference_forward(state2, action2, params)
    np.testing.assert_allclose(np.asarray(out2), np.asarray(ref2),
                               rtol=2e-2, atol=2e-2)

    print("KERNEL_OK")
</pallas_src>

<mosaic_0001>
module attributes {stable_mosaic.version = 11 : i64} {
  func.func @_critic_kernel(%arg0: i32, %arg1: memref<8x16xf32, #tpu.memory_space<vmem>>, %arg2: memref<8x8xf32, #tpu.memory_space<vmem>>, %arg3: memref<16x128xbf16, #tpu.memory_space<vmem>>, %arg4: memref<1x128xf32, #tpu.memory_space<vmem>>, %arg5: memref<128x128xbf16, #tpu.memory_space<vmem>>, %arg6: memref<8x128xbf16, #tpu.memory_space<vmem>>, %arg7: memref<1x128xf32, #tpu.memory_space<vmem>>, %arg8: memref<128x128xbf16, #tpu.memory_space<vmem>>, %arg9: memref<1x128xf32, #tpu.memory_space<vmem>>, %arg10: memref<8x128xbf16, #tpu.memory_space<vmem>>) attributes {dimension_semantics = [#tpu.dimension_semantics<parallel>], iteration_bounds = array<i64: 1>, scalar_prefetch = 0 : i64, scratch_operands = 0 : i64, tpu.core_type = #tpu.core_type<tc>, window_params = [{transform_indices = @transform_0, window_bounds = array<i64: 8, 16>}, {transform_indices = @transform_1, window_bounds = array<i64: 8, 8>}, {pipeline_mode = #tpu.pipeline_mode<synchronous>, transform_indices = @transform_2, window_bounds = array<i64: 16, 128>}, {pipeline_mode = #tpu.pipeline_mode<synchronous>, transform_indices = @transform_3, window_bounds = array<i64: 1, 128>}, {pipeline_mode = #tpu.pipeline_mode<synchronous>, transform_indices = @transform_4, window_bounds = array<i64: 128, 128>}, {pipeline_mode = #tpu.pipeline_mode<synchronous>, transform_indices = @transform_5, window_bounds = array<i64: 8, 128>}, {pipeline_mode = #tpu.pipeline_mode<synchronous>, transform_indices = @transform_6, window_bounds = array<i64: 1, 128>}, {pipeline_mode = #tpu.pipeline_mode<synchronous>, transform_indices = @transform_7, window_bounds = array<i64: 128, 128>}, {pipeline_mode = #tpu.pipeline_mode<synchronous>, transform_indices = @transform_8, window_bounds = array<i64: 1, 128>}, {transform_indices = @transform_9, window_bounds = array<i64: 8, 128>}]} {
    %c0 = arith.constant 0 : index
    %c0_0 = arith.constant 0 : index
    %0 = vector.load %arg1[%c0, %c0_0] : memref<8x16xf32, #tpu.memory_space<vmem>>, vector<8x16xf32>
    %1 = arith.truncf %0 : vector<8x16xf32> to vector<8x16xbf16>
    %c0_1 = arith.constant 0 : index
    %c0_2 = arith.constant 0 : index
    %2 = vector.load %arg2[%c0_1, %c0_2] : memref<8x8xf32, #tpu.memory_space<vmem>>, vector<8x8xf32>
    %3 = arith.truncf %2 : vector<8x8xf32> to vector<8x8xbf16>
    %c0_3 = arith.constant 0 : index
    %c0_4 = arith.constant 0 : index
    %4 = vector.load %arg3[%c0_3, %c0_4] : memref<16x128xbf16, #tpu.memory_space<vmem>>, vector<16x128xbf16>
    %cst = arith.constant dense<0.000000e+00> : vector<8x128xf32>
    %5 = tpu.matmul %1, %4, %cst {dimension_numbers = #tpu.dot_dimension_numbers<[1], [0], [0], [1], [0, 0, 1, 1], [], []>} : vector<8x16xbf16>, vector<16x128xbf16>, vector<8x128xf32> -> vector<8x128xf32>
    %c0_5 = arith.constant 0 : index
    %c0_6 = arith.constant 0 : index
    %6 = vector.load %arg4[%c0_5, %c0_6] : memref<1x128xf32, #tpu.memory_space<vmem>>, vector<1x128xf32>
    %7 = vector.broadcast %6 : vector<1x128xf32> to vector<8x128xf32>
    %8 = arith.addf %5, %7 : vector<8x128xf32>
    %cst_7 = arith.constant 0.000000e+00 : f32
    %9 = vector.broadcast %cst_7 : f32 to vector<8x128xf32>
    %10 = arith.maximumf %8, %9 : vector<8x128xf32>
    %11 = arith.truncf %10 : vector<8x128xf32> to vector<8x128xbf16>
    %c0_8 = arith.constant 0 : index
    %c0_9 = arith.constant 0 : index
    %12 = vector.load %arg5[%c0_8, %c0_9] : memref<128x128xbf16, #tpu.memory_space<vmem>>, vector<128x128xbf16>
    %cst_10 = arith.constant dense<0.000000e+00> : vector<8x128xf32>
    %13 = tpu.matmul %11, %12, %cst_10 {dimension_numbers = #tpu.dot_dimension_numbers<[1], [0], [0], [1], [0, 0, 1, 1], [], []>} : vector<8x128xbf16>, vector<128x128xbf16>, vector<8x128xf32> -> vector<8x128xf32>
    %c0_11 = arith.constant 0 : index
    %c0_12 = arith.constant 0 : index
    %14 = vector.load %arg6[%c0_11, %c0_12] : memref<8x128xbf16, #tpu.memory_space<vmem>>, vector<8x128xbf16>
    %cst_13 = arith.constant dense<0.000000e+00> : vector<8x128xf32>
    %15 = tpu.matmul %3, %14, %cst_13 {dimension_numbers = #tpu.dot_dimension_numbers<[1], [0], [0], [1], [0, 0, 1, 1], [], []>} : vector<8x8xbf16>, vector<8x128xbf16>, vector<8x128xf32> -> vector<8x128xf32>
    %16 = arith.addf %13, %15 : vector<8x128xf32>
    %c0_14 = arith.constant 0 : index
    %c0_15 = arith.constant 0 : index
    %17 = vector.load %arg7[%c0_14, %c0_15] : memref<1x128xf32, #tpu.memory_space<vmem>>, vector<1x128xf32>
    %18 = vector.broadcast %17 : vector<1x128xf32> to vector<8x128xf32>
    %19 = arith.addf %16, %18 : vector<8x128xf32>
    %cst_16 = arith.constant 0.000000e+00 : f32
    %20 = vector.broadcast %cst_16 : f32 to vector<8x128xf32>
    %21 = arith.maximumf %19, %20 : vector<8x128xf32>
    %22 = arith.truncf %21 : vector<8x128xf32> to vector<8x128xbf16>
    %c0_17 = arith.constant 0 : index
    %c0_18 = arith.constant 0 : index
    %23 = vector.load %arg8[%c0_17, %c0_18] : memref<128x128xbf16, #tpu.memory_space<vmem>>, vector<128x128xbf16>
    %cst_19 = arith.constant dense<0.000000e+00> : vector<8x128xf32>
    %24 = tpu.matmul %22, %23, %cst_19 {dimension_numbers = #tpu.dot_dimension_numbers<[1], [0], [0], [1], [0, 0, 1, 1], [], []>} : vector<8x128xbf16>, vector<128x128xbf16>, vector<8x128xf32> -> vector<8x128xf32>
    %c0_20 = arith.constant 0 : index
    %c0_21 = arith.constant 0 : index
    %25 = vector.load %arg9[%c0_20, %c0_21] : memref<1x128xf32, #tpu.memory_space<vmem>>, vector<1x128xf32>
    %26 = vector.broadcast %25 : vector<1x128xf32> to vector<8x128xf32>
    %27 = arith.addf %24, %26 : vector<8x128xf32>
    %28 = arith.truncf %27 : vector<8x128xf32> to vector<8x128xbf16>
    %c0_22 = arith.constant 0 : index
    %c0_23 = arith.constant 0 : index
    %29 = vector.load %arg10[%c0_22, %c0_23] : memref<8x128xbf16, #tpu.memory_space<vmem>>, vector<8x128xbf16>
    tpu.vector_store %arg10[%c0_22, %c0_23], %28 {strides = array<i32>} : memref<8x128xbf16, #tpu.memory_space<vmem>>, vector<8x128xbf16>,
    return
  }
  func.func @transform_0(%arg0: i32) -> (i32, i32) {
    %c0_i32 = arith.constant 0 : i32
    %c0_i32_0 = arith.constant 0 : i32
    return %arg0, %c0_i32 : i32, i32
  }
  func.func @transform_1(%arg0: i32) -> (i32, i32) {
    %c0_i32 = arith.constant 0 : i32
    %c0_i32_0 = arith.constant 0 : i32
    return %arg0, %c0_i32 : i32, i32
  }
  func.func @transform_2(%arg0: i32) -> (i32, i32) {
    %c0_i32 = arith.constant 0 : i32
    %c0_i32_0 = arith.constant 0 : i32
    %c0_i32_1 = arith.constant 0 : i32
    return %c0_i32, %c0_i32_0 : i32, i32
  }
  func.func @transform_3(%arg0: i32) -> (i32, i32) {
    %c0_i32 = arith.constant 0 : i32
    %c0_i32_0 = arith.constant 0 : i32
    %c0_i32_1 = arith.constant 0 : i32
    return %c0_i32, %c0_i32_0 : i32, i32
  }
  func.func @transform_4(%arg0: i32) -> (i32, i32) {
    %c0_i32 = arith.constant 0 : i32
    %c0_i32_0 = arith.constant 0 : i32
    %c0_i32_1 = arith.constant 0 : i32
    return %c0_i32, %c0_i32_0 : i32, i32
  }
  func.func @transform_5(%arg0: i32) -> (i32, i32) {
    %c0_i32 = arith.constant 0 : i32
    %c0_i32_0 = arith.constant 0 : i32
    %c0_i32_1 = arith.constant 0 : i32
    return %c0_i32, %c0_i32_0 : i32, i32
  }
  func.func @transform_6(%arg0: i32) -> (i32, i32) {
    %c0_i32 = arith.constant 0 : i32
    %c0_i32_0 = arith.constant 0 : i32
    %c0_i32_1 = arith.constant 0 : i32
    return %c0_i32, %c0_i32_0 : i32, i32
  }
  func.func @transform_7(%arg0: i32) -> (i32, i32) {
    %c0_i32 = arith.constant 0 : i32
    %c0_i32_0 = arith.constant 0 : i32
    %c0_i32_1 = arith.constant 0 : i32
    return %c0_i32, %c0_i32_0 : i32, i32
  }
  func.func @transform_8(%arg0: i32) -> (i32, i32) {
    %c0_i32 = arith.constant 0 : i32
    %c0_i32_0 = arith.constant 0 : i32
    %c0_i32_1 = arith.constant 0 : i32
    return %c0_i32, %c0_i32_0 : i32, i32
  }
  func.func @transform_9(%arg0: i32) -> (i32, i32) {
    %c0_i32 = arith.constant 0 : i32
    %c0_i32_0 = arith.constant 0 : i32
    return %arg0, %c0_i32 : i32, i32
  }
}

</mosaic_0001>

<bundles_post_ra>
// kernel: tpu_custom_call.1
= control target key start
LH: loop header
LB: loop body
LE: loop exit
PB: predicated region body
PF: predicated region fallthrough
CT: control target
= control target key end

     0   :  { %14 = vsyncpa [#allocation3], 0  ;;  %s898_s0 = inlined_call_operand.hbm [shape: f32[8,16], index: 0, kind: input, shape index: {}]   ;;  %s899_s1 = inlined_call_operand.hbm [shape: f32[8,8], index: 1, kind: input, shape index: {}]   ;;  %s900_s2 = inlined_call_operand.hbm [shape: bf16[16,128], index: 2, kind: input, shape index: {}]   ;;  %s901_s3 = inlined_call_operand.vmem [shape: f32[1,128], index: 3, kind: input, shape index: {}]   ;;  %s902_s4 = inlined_call_operand.hbm [shape: bf16[128,128], index: 4, kind: input, shape index: {}]   ;;  %s903_s5 = inlined_call_operand.vmem [shape: bf16[8,128], index: 5, kind: input, shape index: {}]   ;;  %s904_s6 = inlined_call_operand.vmem [shape: f32[1,128], index: 6, kind: input, shape index: {}]   ;;  %s905_s7 = inlined_call_operand.hbm [shape: bf16[128,128], index: 7, kind: input, shape index: {}]   ;;  %s906_s8 = inlined_call_operand.vmem [shape: f32[1,128], index: 8, kind: input, shape index: {}]   ;;  %s907_s9 = inlined_call_operand.hbm [shape: bf16[8,128], index: 9, kind: output, shape index: {}]  }
   0x1   :  { %15 = vsyncpa [#allocation6], 0 }
   0x2   :  { %16 = vsyncpa [#allocation9], 0 }
   0x3   :  { %17 = vsyncpa [#allocation4], 0  ;;  %s719_s30 = smov [#allocation5]   ;;  %s579_s13 = scalar_lea.hbm %s899_s1, 128 }
   0x4   :  { %s34_s10 = sshll.u32 %s719_s30, 4  ;;  %p580_p0 = scmp.ne.s32.totalorder %s899_s1, %s579_s13  ;;  %s35_s10 = int_to_ptr.vmem [resolvable:$true] %s34_s10 }
   0x5   :  { %p583_p1 = scmp.lt.u32.totalorder %s579_s13, %s899_s1 }
   0x7   :  { %p585_p2 = pnand %p583_p1, %p580_p0 }
   0x9   :  { %588 = shalt.err (!%p585_p2)
}
   0xa   :  { %s589_s18 = scalar_lea.vmem %s35_s10, 128  ;;  %p594_p4 = scmp.lt.s32.totalorder %s35_s10, %s35_s10 }
   0xb   :  { %p590_p3 = scmp.ne.s32.totalorder %s35_s10, %s589_s18  ;;  %p595_p5 = scmp.lt.s32.totalorder %s589_s18, %s589_s18 }
   0xd   :  { %p596_p6 = por %p595_p5, %p594_p4 }
   0xf   :  { %p597_p7 = pnand %p596_p6, %p590_p3 }
  0x11   :  { %600 = shalt.err (!%p597_p7)
}
  0x12   :  { %37 = dma.hbm_to_vmem [thread:$0]  %s899_s1, 128, %s35_s10, [#allocation6]  }
  0x13   :  { %s720_s21 = smov [#allocation8]   ;;  %s721_s23 = smov [#allocation2]  }
  0x14   :  { %s57_s22 = sshll.u32 %s720_s21, 4  ;;  %s24_s24 = sshll.u32 %s721_s23, 4  ;;  %s58_s22 = int_to_ptr.vmem [resolvable:$true] %s57_s22  ;;  %s25_s24 = int_to_ptr.vmem [resolvable:$true] %s24_s24 }
  0x15   :  { %s601_s27 = scalar_lea.hbm %s902_s4, 1024 }
  0x16   :  { %p602_p8 = scmp.ne.s32.totalorder %s902_s4, %s601_s27  ;;  %p605_p9 = scmp.lt.u32.totalorder %s601_s27, %s902_s4 }
  0x18   :  { %p607_p10 = pnand %p605_p9, %p602_p8 }
  0x1a   :  { %610 = shalt.err (!%p607_p10)
}
  0x1b   :  { %s611_s1 = scalar_lea.vmem %s58_s22, 1024  ;;  %p616_p12 = scmp.lt.s32.totalorder %s58_s22, %s58_s22 }
  0x1c   :  { %p612_p11 = scmp.ne.s32.totalorder %s58_s22, %s611_s1  ;;  %p617_p13 = scmp.lt.s32.totalorder %s611_s1, %s611_s1 }
  0x1e   :  { %p618_p0 = por %p617_p13, %p616_p12 }
  0x20   :  { %p619_p1 = pnand %p618_p0, %p612_p11 }
  0x22   :  { %622 = shalt.err (!%p619_p1)
}
  0x23   :  { %s722_s10 = smov 64   ;;  %s723_s12 = smov 4  }
  0x24   :  { %63 = dma.hbm_to_vmem [thread:$0]  %s902_s4, 1024, %s58_s22, [#allocation9], %s722_s10, %s722_s10, %s723_s12  }
  0x25   :  { %s623_s17 = scalar_lea.hbm %s898_s0, 128 }
  0x26   :  { %p624_p2 = scmp.ne.s32.totalorder %s898_s0, %s623_s17  ;;  %p627_p3 = scmp.lt.u32.totalorder %s623_s17, %s898_s0 }
  0x28   :  { %p629_p4 = pnand %p627_p3, %p624_p2 }
  0x2a   :  { %632 = shalt.err (!%p629_p4)
}
  0x2b   :  { %s633_s23 = scalar_lea.vmem %s25_s24, 128  ;;  %p638_p6 = scmp.lt.s32.totalorder %s25_s24, %s25_s24 }
  0x2c   :  { %p634_p5 = scmp.ne.s32.totalorder %s25_s24, %s633_s23  ;;  %p639_p7 = scmp.lt.s32.totalorder %s633_s23, %s633_s23 }
  0x2e   :  { %p640_p8 = por %p639_p7, %p638_p6 }
  0x30   :  { %p641_p9 = pnand %p640_p8, %p634_p5 }
  0x32   :  { %644 = shalt.err (!%p641_p9)
}
  0x33   :  { %27 = dma.hbm_to_vmem [thread:$0]  %s898_s0, 128, %s25_s24, [#allocation3]  }
  0x34   :  { %s724_s25 = smov [#allocation7]   ;;  %s725_s27 = smov [#allocation10]  }
  0x35   :  { %s43_s26 = sshll.u32 %s724_s25, 4  ;;  %s73_s28 = sshll.u32 %s725_s27, 4  ;;  %s44_s26 = int_to_ptr.vmem [resolvable:$true] %s43_s26  ;;  %s74_s28 = int_to_ptr.vmem [resolvable:$true] %s73_s28 }
  0x36   :  { %s645_s11 = scalar_lea.hbm %s900_s2, 128 }
  0x37   :  { %p646_p10 = scmp.ne.s32.totalorder %s900_s2, %s645_s11  ;;  %p649_p11 = scmp.lt.u32.totalorder %s645_s11, %s900_s2 }
  0x39   :  { %p651_p12 = pnand %p649_p11, %p646_p10 }
  0x3b   :  { %654 = shalt.err (!%p651_p12)
}
  0x3c   :  { %s655_s0 = scalar_lea.vmem %s44_s26, 128  ;;  %p660_p0 = scmp.lt.s32.totalorder %s44_s26, %s44_s26 }
  0x3d   :  { %p656_p13 = scmp.ne.s32.totalorder %s44_s26, %s655_s0  ;;  %p661_p1 = scmp.lt.s32.totalorder %s655_s0, %s655_s0 }
  0x3f   :  { %p662_p2 = por %p661_p1, %p660_p0 }
  0x41   :  { %p663_p3 = pnand %p662_p2, %p656_p13 }
  0x43   :  { %666 = shalt.err (!%p663_p3)
}
  0x44   :  { %49 = dma.hbm_to_vmem [thread:$0]  %s900_s2, 128, %s44_s26, [#allocation6], %s722_s10, %s722_s10, %s723_s12  }
  0x45   :  { %s667_s19 = scalar_lea.hbm %s905_s7, 1024 }
  0x46   :  { %p668_p4 = scmp.ne.s32.totalorder %s905_s7, %s667_s19  ;;  %p671_p5 = scmp.lt.u32.totalorder %s667_s19, %s905_s7 }
  0x48   :  { %p673_p6 = pnand %p671_p5, %p668_p4 }
  0x4a   :  { %676 = shalt.err (!%p673_p6)
}
  0x4b   :  { %s677_s22 = scalar_lea.vmem %s74_s28, 1024  ;;  %p682_p8 = scmp.lt.s32.totalorder %s74_s28, %s74_s28 }
  0x4c   :  { %p678_p7 = scmp.ne.s32.totalorder %s74_s28, %s677_s22  ;;  %p683_p9 = scmp.lt.s32.totalorder %s677_s22, %s677_s22 }
  0x4e   :  { %p684_p10 = por %p683_p9, %p682_p8 }
  0x50   :  { %p685_p11 = pnand %p684_p10, %p678_p7 }
  0x52   :  { %688 = shalt.err (!%p685_p11)
}
  0x53   :  { %79 = dma.hbm_to_vmem [thread:$0]  %s905_s7, 1024, %s74_s28, [#allocation9], %s722_s10, %s722_s10, %s723_s12  }
  0x54   :  { %711 = dma.done.wait [#allocation3], 128  }
  0x55   :  { %712 = vsyncadd [#allocation3], 4294967168 }
  0x56   :  { %713 = dma.done.wait [#allocation6], 256  }
  0x57   :  { %714 = vsyncadd [#allocation6], 4294967040 }
  0x58   :  { %715 = dma.done.wait [#allocation9], 2048  }
  0x59   :  { %716 = vsyncadd [#allocation9], 4294965248  ;;  %v726_v0 = vmov 0.0   ;;  %vm727_vm0 = vmmov 0   ;;  %v562_v1 = vld [vmem:[#allocation7] sm:$0xff]   ;;  %v98_v2 = vld [vmem:[#allocation2] sm:$0xff] }
  0x5a   :  { %500 = vmatprep.subr.bf16.mxu0 %v726_v0  ;;  %502 = vmatprep.mubr.msk.bf16.mxu0 %vm727_vm0, %v726_v0  ;;  %v99_v3 = vpack.c.bf16 %v98_v2, %v98_v2  ;;  %vm117_vm1 = vcmask 130048   ;;  %v563_v4 = vld [vmem:[#allocation8] sm:$0xff]   ;;  %v564_v5 = vld [vmem:[#allocation8 + $0x8] sm:$0xff]   ;;  %v565_v6 = vld [vmem:[#allocation8 + $0x10] sm:$0xff]   ;;  %vm184_vm2 = vcmask 1043456   ;;  %vm180_vm3 = vcmask 64512  }
  0x5b   :  { %506 = vmatprep.subr.bf16.mxu1 %v726_v0  ;;  %508 = vmatprep.mubr.msk.bf16.mxu1 %vm727_vm0, %v726_v0  ;;  %v566_v7 = vld [vmem:[#allocation8 + $0x18] sm:$0xff]   ;;  %v567_v8 = vld [vmem:[#allocation8 + $0x20] sm:$0xff]   ;;  %v568_v9 = vld [vmem:[#allocation8 + $0x28] sm:$0xff]   ;;  %s728_s29 = smov [#allocation11]  }
  0x5c   :  { %501 = vmatpush3.bf16.msra.mxu0 %v562_v1  ;;  %v569_v10 = vld [vmem:[#allocation8 + $0x30] sm:$0xff]   ;;  %v179_v11 = vld [vmem:[%s903_s5] sm:$0xf]  ;;  %v570_v15 = vld [vmem:[#allocation8 + $0x38] sm:$0xff]   ;;  %s445_s30 = sshll.u32 %s728_s29, 4  ;;  %s446_s30 = int_to_ptr.vmem [resolvable:$true] %s445_s30 }
  0x5d   :  { %512 = vmatprep.subr.bf16.mxu0 %v726_v0  ;;  %v186_v12 = vsel %vm184_vm2, %v179_v11, 0  ;;  %v100_v13 = vld [vmem:[#allocation5] sm:$0xff]  ;;  %v571_v16 = vld [vmem:[#allocation10] sm:$0xff]   ;;  %v572_v17 = vld [vmem:[#allocation10 + $0x8] sm:$0xff]   ;;  %p694_p13 = scmp.lt.s32.totalorder %s446_s30, %s446_s30 }
  0x5e   :  { %507 = vmatpush3.bf16.msra.mxu1 %v186_v12  ;;  %v101_v14 = vpack.c.bf16 %v100_v13, %v100_v13  ;;  %v573_v18 = vld [vmem:[#allocation10 + $0x10] sm:$0xff]   ;;  %v574_v19 = vld [vmem:[#allocation10 + $0x18] sm:$0xff]   ;;  %v575_v20 = vld [vmem:[#allocation10 + $0x20] sm:$0xff]  }
  0x5f   :  { %503 = vmatmul.mubr.msk.bf16.vlgmr.msra.gmra.mrb[0].mxu0 %vm117_vm1, %v99_v3  ;;  %532 = vmatprep.subr.bf16.mxu1 %v726_v0  ;;  %v576_v21 = vld [vmem:[#allocation10 + $0x28] sm:$0xff]   ;;  %v577_v34 = vld [vmem:[#allocation10 + $0x30] sm:$0xff]   ;;  %v578_v35 = vld [vmem:[#allocation10 + $0x38] sm:$0xff]  }
  0x60   :  { %513 = vmatpush3.bf16.msra.mxu0 %v563_v4  ;;  %528 = vmatprep.mubr.msk.bf16.mxu0 %vm727_vm0, %v726_v0  ;;  %v456_v22 = vld [vmem:[%s901_s3] ss:$0 sm:$0xff] }
  0x61   :  { %514 = vmatprep.subr.bf16.mxu0 %v726_v0  ;;  %509 = vmatmul.mubr.msk.bf16.vlgmr.msra.gmra.mrb[0].mxu1 %vm180_vm3, %v101_v14  ;;  %v468_v37 = vld [vmem:[%s904_s6] ss:$0 sm:$0xff]  ;;  %s689_s6 = scalar_lea.vmem %s446_s30, 64 }
  0x62   :  { %548 = vmatprep.mubr.msk.bf16.mxu1 %vm727_vm0, %v726_v0  ;;  %533 = vmatpush3.bf16.msra.mxu1 %v571_v16  ;;  %v469_v45 = vld [vmem:[%s906_s8] ss:$0 sm:$0xff]  ;;  %p690_p12 = scmp.ne.s32.totalorder %s446_s30, %s689_s6  ;;  %p695_p0 = scmp.lt.s32.totalorder %s689_s6, %s689_s6 }
  0x63   :  { %534 = vmatprep.subr.bf16.mxu1 %v726_v0 }
  0x64   :  { %515 = vmatpush3.bf16.msra.mxu0 %v564_v5  ;;  %p696_p1 = por %p695_p0, %p694_p13 }
  0x65   :  { %516 = vmatprep.subr.bf16.mxu0 %v726_v0 }
  0x66   :  { %535 = vmatpush3.bf16.msra.mxu1 %v572_v17  ;;  %p697_p2 = pnand %p696_p1, %p690_p12 }
  0x67   :  { %536 = vmatprep.subr.bf16.mxu1 %v726_v0 }
  0x68   :  { %517 = vmatpush3.bf16.msra.mxu0 %v565_v6 }
  0x69   :  { %518 = vmatprep.subr.bf16.mxu0 %v726_v0 }
  0x6a   :  { %537 = vmatpush3.bf16.msra.mxu1 %v573_v18 }
  0x6b   :  { %538 = vmatprep.subr.bf16.mxu1 %v726_v0 }
  0x6c   :  { %519 = vmatpush3.bf16.msra.mxu0 %v566_v7 }
  0x6d   :  { %520 = vmatprep.subr.bf16.mxu0 %v726_v0 }
  0x6e   :  { %539 = vmatpush3.bf16.msra.mxu1 %v574_v19 }
  0x6f   :  { %540 = vmatprep.subr.bf16.mxu1 %v726_v0 }
  0x70   :  { %521 = vmatpush3.bf16.msra.mxu0 %v567_v8 }
  0x71   :  { %522 = vmatprep.subr.bf16.mxu0 %v726_v0 }
  0x72   :  { %541 = vmatpush3.bf16.msra.mxu1 %v575_v20 }
  0x73   :  { %542 = vmatprep.subr.bf16.mxu1 %v726_v0 }
  0x74   :  { %523 = vmatpush3.bf16.msra.mxu0 %v568_v9 }
  0x75   :  { %524 = vmatprep.subr.bf16.mxu0 %v726_v0 }
  0x76   :  { %543 = vmatpush3.bf16.msra.mxu1 %v576_v21 }
  0x77   :  { %544 = vmatprep.subr.bf16.mxu1 %v726_v0 }
  0x78   :  { %525 = vmatpush3.bf16.msra.mxu0 %v569_v10 }
  0x79   :  { %526 = vmatprep.subr.bf16.mxu0 %v726_v0 }
  0x7a   :  { %545 = vmatpush3.bf16.msra.mxu1 %v577_v34 }
  0x7b   :  { %546 = vmatprep.subr.bf16.mxu1 %v726_v0 }
  0x7c   :  { %527 = vmatpush3.bf16.msra.mxu0 %v570_v15 }
  0x7e   :  { %547 = vmatpush3.bf16.msra.mxu1 %v578_v35 }
 0x132   :  { %v155_v23 = vpop.f32.mrb[0].mxu0 }
 0x133   :  { %v156_v24 = vadd.f32 %v456_v22, %v155_v23  ;;  %v504_v25 = vpop.f32.mrb[1].mxu0 }
 0x134   :  { %v158_v26 = vpop.f32.mrb[2].mxu0  ;;  %v222_v30 = vpop.f32.mrb[0].mxu1 }
 0x135   :  { %v161_v27 = vmax.f32 %v156_v24, 0.0  ;;  %v505_v28 = vpop.f32.mrb[3].mxu0  ;;  %v510_v31 = vpop.f32.mrb[1].mxu1 }
 0x136   :  { %v225_v32 = vpop.f32.mrb[2].mxu1 }
 0x137   :  { %v162_v29 = vpack.c.bf16 %v161_v27, %v161_v27  ;;  %v511_v33 = vpop.f32.mrb[3].mxu1 }
 0x139   :  { %529 = vmatmul.mubr.bf16.vlgmr.msra.gmra.mrb[4].mxu0 %v162_v29 }
 0x20c   :  { %v310_v36 = vpop.f32.mrb[4].mxu0 }
 0x20d   :  { %v311_v38 = vadd.f32 %v310_v36, %v222_v30  ;;  %v530_v39 = vpop.f32.mrb[5].mxu0 }
 0x20e   :  { %v313_v40 = vpop.f32.mrb[6].mxu0 }
 0x20f   :  { %v323_v41 = vadd.f32 %v468_v37, %v311_v38  ;;  %v531_v42 = vpop.f32.mrb[7].mxu0 }
 0x211   :  { %v324_v43 = vmax.f32 %v323_v41, 0.0 }
 0x213   :  { %v325_v44 = vpack.c.bf16 %v324_v43, %v324_v43 }
 0x215   :  { %549 = vmatmul.mubr.bf16.vlgmr.msra.gmra.mrb[4].mxu1 %v325_v44 }
 0x2e8   :  { %v431_v46 = vpop.f32.mrb[4].mxu1 }
 0x2e9   :  { %v432_v47 = vadd.f32 %v469_v45, %v431_v46  ;;  %v550_v48 = vpop.f32.mrb[5].mxu1 }
 0x2ea   :  { %v434_v49 = vpop.f32.mrb[6].mxu1 }
 0x2eb   :  { %v437_v50 = vpack.c.bf16 %v432_v47, %v432_v47  ;;  %v551_v51 = vpop.f32.mrb[7].mxu1 }
 0x2ed   :  { %438 = vst [vmem:[#allocation11] sm:$0xf] %v437_v50 }
 0x2ee   :  { %700 = shalt.err (!%p697_p2)
}
 0x2ef   :  { %s701_s8 = scalar_lea.hbm %s907_s9, 64 }
 0x2f0   :  { %p702_p3 = scmp.ne.s32.totalorder %s907_s9, %s701_s8  ;;  %p705_p4 = scmp.lt.u32.totalorder %s701_s8, %s907_s9 }
 0x2f2   :  { %p707_p5 = pnand %p705_p4, %p702_p3 }
 0x2f4   :  { %710 = shalt.err (!%p707_p5)
}
 0x2f5   :  { %448 = dma.vmem_to_hbm [thread:$0]  %s446_s30, 64, %s907_s9, [#allocation4]  }
 0x2f6   :  { %717 = dma.done.wait [#allocation4], 64  }
 0x2f7   :  { %718 = vsyncadd [#allocation4], 4294967232 }
 0x2f8   :  { %452 = vsyncpa [#allocation3], 1 }
 0x2f9   :  { %453 = vsyncpa [#allocation6], 1 }
 0x2fa   :  { %454 = vsyncpa [#allocation9], 1 }
 0x2fb   :  { %455 = vsyncpa [#allocation4], 1 }

</bundles_post_ra>
